<compile_context>
chip_gen: v7x
topology: tpu7x:2x2x1
jax: 0.10.0
libtpu: 0.0.40
codegen_flags: <defaults>
</compile_context>

<pallas_src>
import functools

import jax
import jax.numpy as jnp
from jax.experimental import pallas as pl
from jax.experimental.pallas import tpu as pltpu


def _round_up(x, m):
    return ((x + m - 1) // m) * m


# ----------------------------- Pallas kernel -----------------------------
def _critic_mlp_kernel(s_ref, a_ref, w1s_ref, w1a_ref, b1_ref,
                       w2_ref, b2_ref, w3_ref, b3_ref, o_ref):
    """One batch tile of the critic MLP, fully resident in VMEM.

    The state/action concat is fused by splitting W1:
        h1 = relu(s @ W1_s + a @ W1_a + b1)
    Matmuls run in bf16 on the MXU with f32 accumulation; bias/ReLU in f32.
    All feature dims are pre-padded to 128 so loads/stores are full-lane.
    The logits tile is stored in bf16 (output HBM stream dominates traffic).
    """
    s = s_ref[...].astype(jnp.bfloat16)
    a = a_ref[...].astype(jnp.bfloat16)

    h1 = (jnp.dot(s, w1s_ref[...], preferred_element_type=jnp.float32)
          + jnp.dot(a, w1a_ref[...], preferred_element_type=jnp.float32)
          + b1_ref[...])
    h1 = jnp.maximum(h1, 0.0)

    h2 = jnp.dot(h1.astype(jnp.bfloat16), w2_ref[...],
                 preferred_element_type=jnp.float32) + b2_ref[...]
    h2 = jnp.maximum(h2, 0.0)

    logits = jnp.dot(h2.astype(jnp.bfloat16), w3_ref[...],
                     preferred_element_type=jnp.float32) + b3_ref[...]
    o_ref[...] = logits.astype(o_ref.dtype)


@functools.partial(jax.jit,
                   static_argnames=("num_atoms", "tile_m", "slice_output"))
def _critic_forward(states, actions, w1_s, w1_a, b1, w2, b2, w3, b3,
                    *, num_atoms, tile_m=4096, slice_output=True):
    """states [N,S] f32, actions [N,A] f32 -> logits.

    slice_output=True  : f32 [N, num_atoms]   (matches the PyTorch module)
    slice_output=False : bf16 [N, atoms_pad]  (lane-padded; padded columns are
                         exactly the padded b3 entries (zeros) and must be
                         dropped before any softmax)
    """
    n, s_dim = states.shape
    a_dim = actions.shape[1]
    h1p = w1_s.shape[1]
    h2p = w2.shape[1]
    atoms_p = w3.shape[1]

    # Defensive tile rounding (user tile_m=500 would break (8,128) lowering).
    tile_m = max(128, _round_up(int(tile_m), 128))

    # Pad the batch only up to 128 alignment, then derive an adaptive tile.
    # Keep >= 2 grid steps whenever there is enough work so (a) the parallel
    # batch axis shards across both v7x TensorCores and (b) input/output DMA
    # double-buffering actually overlaps compute.
    n_pad128 = _round_up(n, 128)
    num_tiles = pl.cdiv(n_pad128, tile_m)
    if n_pad128 >= 256:
        num_tiles = max(num_tiles, 2)
    tile = _round_up(pl.cdiv(n_pad128, num_tiles), 128)
    n_pad = num_tiles * tile

    if n_pad != n:
        pad = n_pad - n
        states = jnp.pad(states, ((0, pad), (0, 0)))
        actions = jnp.pad(actions, ((0, pad), (0, 0)))

    grid = (num_tiles,)
    const = lambda i: (0, 0)  # weights/biases: same block every grid step

    weight_elems = s_dim * h1p + a_dim * h1p + h1p * h2p + h2p * atoms_p
    flops = 2 * n_pad * weight_elems
    bytes_accessed = (n_pad * (s_dim + a_dim) * 4      # f32 inputs
                      + n_pad * atoms_p * 2            # bf16 output
                      + 2 * weight_elems               # bf16 weights
                      + 4 * (h1p + h2p + atoms_p))     # f32 biases

    out = pl.pallas_call(
        _critic_mlp_kernel,
        out_shape=jax.ShapeDtypeStruct((n_pad, atoms_p), jnp.bfloat16),
        grid_spec=pl.GridSpec(
            grid=grid,
            in_specs=[
                pl.BlockSpec((tile, s_dim), lambda i: (i, 0)),   # states tile
                pl.BlockSpec((tile, a_dim), lambda i: (i, 0)),   # actions tile
                pl.BlockSpec((s_dim, h1p), const),               # W1 (state rows)
                pl.BlockSpec((a_dim, h1p), const),               # W1 (action rows)
                pl.BlockSpec((1, h1p), const),                   # b1
                pl.BlockSpec((h1p, h2p), const),                 # W2
                pl.BlockSpec((1, h2p), const),                   # b2
                pl.BlockSpec((h2p, atoms_p), const),             # W3
                pl.BlockSpec((1, atoms_p), const),               # b3
            ],
            out_specs=pl.BlockSpec((tile, atoms_p), lambda i: (i, 0)),
        ),
        compiler_params=pltpu.CompilerParams(
            dimension_semantics=("parallel",),
            vmem_limit_bytes=64 * 1024 * 1024),
        cost_estimate=pl.CostEstimate(flops=flops, transcendentals=0,
                                      bytes_accessed=bytes_accessed),
    )(states, actions, w1_s, w1_a, b1, w2, b2, w3, b3)

    if slice_output:
        # Fused inside this jit: one pass over the narrow bf16 slab.
        return out[:n, :num_atoms].astype(jnp.float32)
    return out[:n]


# ----------------------------- QFitterDD (forward only) -------------------
class QFitterDDPallas:
    def __init__(self, state_dim, action_dim, hidden_sizes, min_reward,
                 max_reward, num_atoms=51, key=None, tile_m=4096):
        # TODO(synk): kernel assumes the standard 2-hidden-layer critic MLP.
        assert len(hidden_sizes) == 2, "kernel assumes two hidden layers"
        self.state_dim = state_dim
        self.action_dim = action_dim
        self.num_atoms = num_atoms
        self.tile_m = tile_m
        self.min_reward = float(min_reward)
        self.max_reward = float(max_reward)
        self.support = jnp.linspace(min_reward, max_reward, num_atoms)

        # Deterministic init (critic_target == critic after the tau=1.0 copy,
        # so only one parameter set matters for forward).  nn.Linear-style
        # uniform(-1/sqrt(fan_in), 1/sqrt(fan_in)) init.
        key = jax.random.PRNGKey(0) if key is None else key
        d_in = state_dim + action_dim
        dims = [d_in] + list(hidden_sizes) + [num_atoms]
        raw = []
        for li in range(len(dims) - 1):
            kw, kb, key = jax.random.split(key, 3)
            bound = 1.0 / float(dims[li]) ** 0.5
            w = jax.random.uniform(kw, (dims[li], dims[li + 1]),
                                   jnp.float32, -bound, bound)
            b = jax.random.uniform(kb, (dims[li + 1],),
                                   jnp.float32, -bound, bound)
            raw += [w, b]
        w1, b1, w2, b2, w3, b3 = raw

        # Pad hidden/output dims to multiples of 128 (lane-dense, tile-aligned)
        # and pack weights as bf16 (MXU); biases stay f32 (VPU math in f32).
        h1, h2 = hidden_sizes
        h1p = _round_up(h1, 128)
        h2p = _round_up(h2, 128)
        atoms_p = _round_up(num_atoms, 128)

        def pad2(m, rows, cols):
            return jnp.pad(m, ((0, rows - m.shape[0]), (0, cols - m.shape[1])))

        # Split W1 so the state/action concat is fused into the kernel.
        self.w1_s = pad2(w1[:state_dim], state_dim, h1p).astype(jnp.bfloat16)
        self.w1_a = pad2(w1[state_dim:], action_dim, h1p).astype(jnp.bfloat16)
        self.b1 = jnp.pad(b1, (0, h1p - h1)).reshape(1, h1p)
        self.w2 = pad2(w2, h1p, h2p).astype(jnp.bfloat16)
        self.b2 = jnp.pad(b2, (0, h2p - h2)).reshape(1, h2p)
        self.w3 = pad2(w3, h2p, atoms_p).astype(jnp.bfloat16)
        self.b3 = jnp.pad(b3, (0, atoms_p - num_atoms)).reshape(1, atoms_p)

    def forward(self, states, actions, batch_size=1000, slice_output=True):
        """Matches QFitterDD.forward semantics (critic_target logits).

        `batch_size` is accepted for API compatibility but unused: a single
        pallas_call grid over the whole batch replaces the Python chunking
        loop + torch.cat of the reference (same result, one HBM pass).
        Set slice_output=False to receive the 128-padded bf16 logits and skip
        the post-kernel slice/cast (consumer must drop the padded columns).
        """
        del batch_size
        return _critic_forward(states, actions,
                               self.w1_s, self.w1_a, self.b1,
                               self.w2, self.b2, self.w3, self.b3,
                               num_atoms=self.num_atoms, tile_m=self.tile_m,
                               slice_output=slice_output)

    __call__ = forward


def _reference_forward(model, states, actions):
    """Pure-JAX reference mirroring the kernel's bf16/f32 numerics exactly."""
    s = states.astype(jnp.bfloat16)
    a = actions.astype(jnp.bfloat16)
    h = (jnp.dot(s, model.w1_s, preferred_element_type=jnp.float32)
         + jnp.dot(a, model.w1_a, preferred_element_type=jnp.float32)
         + model.b1)
    h = jnp.maximum(h, 0.0)
    h = jnp.dot(h.astype(jnp.bfloat16), model.w2,
                preferred_element_type=jnp.float32) + model.b2
    h = jnp.maximum(h, 0.0)
    out = jnp.dot(h.astype(jnp.bfloat16), model.w3,
                  preferred_element_type=jnp.float32) + model.b3
    # Match the kernel's bf16 store then the wrapper's f32 cast.
    return out.astype(jnp.bfloat16).astype(jnp.float32)[:, :model.num_atoms]


if __name__ == "__main__":
    # Small, MLP-consistent shapes.
    N, STATE_DIM, ACTION_DIM = 16, 16, 8
    HIDDEN_SIZES = [32, 32]
    NUM_ATOMS = 51

    model = QFitterDDPallas(STATE_DIM, ACTION_DIM, HIDDEN_SIZES,
                            min_reward=0.0, max_reward=10.0,
                            num_atoms=NUM_ATOMS,
                            key=jax.random.PRNGKey(0))

    kx = jax.random.PRNGKey(0)
    ks, ka = jax.random.split(kx)
    states = jax.random.normal(ks, (N, STATE_DIM), jnp.float32)
    actions = jax.random.normal(ka, (N, ACTION_DIM), jnp.float32)

    logits = model.forward(states, actions)          # batch_size ignored
    logits = jax.block_until_ready(logits)

    ref = _reference_forward(model, states, actions)
    assert logits.shape == (N, NUM_ATOMS)
    assert logits.dtype == jnp.float32
    assert jnp.allclose(logits, ref, atol=2e-2, rtol=2e-2), (
        float(jnp.max(jnp.abs(logits - ref))))

    print("KERNEL_OK")
</pallas_src>

<mosaic_0001>
module attributes {stable_mosaic.version = 11 : i64} {
  func.func @_critic_mlp_kernel(%arg0: i32, %arg1: memref<128x16xf32, #tpu.memory_space<vmem>>, %arg2: memref<128x8xf32, #tpu.memory_space<vmem>>, %arg3: memref<16x128xbf16, #tpu.memory_space<vmem>>, %arg4: memref<8x128xbf16, #tpu.memory_space<vmem>>, %arg5: memref<1x128xf32, #tpu.memory_space<vmem>>, %arg6: memref<128x128xbf16, #tpu.memory_space<vmem>>, %arg7: memref<1x128xf32, #tpu.memory_space<vmem>>, %arg8: memref<128x128xbf16, #tpu.memory_space<vmem>>, %arg9: memref<1x128xf32, #tpu.memory_space<vmem>>, %arg10: memref<128x128xbf16, #tpu.memory_space<vmem>>) attributes {dimension_semantics = [#tpu.dimension_semantics<parallel>], iteration_bounds = array<i64: 1>, scalar_prefetch = 0 : i64, scratch_operands = 0 : i64, tpu.core_type = #tpu.core_type<tc>, window_params = [{transform_indices = @transform_0, window_bounds = array<i64: 128, 16>}, {transform_indices = @transform_1, window_bounds = array<i64: 128, 8>}, {pipeline_mode = #tpu.pipeline_mode<synchronous>, transform_indices = @transform_2, window_bounds = array<i64: 16, 128>}, {pipeline_mode = #tpu.pipeline_mode<synchronous>, transform_indices = @transform_3, window_bounds = array<i64: 8, 128>}, {pipeline_mode = #tpu.pipeline_mode<synchronous>, transform_indices = @transform_4, window_bounds = array<i64: 1, 128>}, {pipeline_mode = #tpu.pipeline_mode<synchronous>, transform_indices = @transform_5, window_bounds = array<i64: 128, 128>}, {pipeline_mode = #tpu.pipeline_mode<synchronous>, transform_indices = @transform_6, window_bounds = array<i64: 1, 128>}, {pipeline_mode = #tpu.pipeline_mode<synchronous>, transform_indices = @transform_7, window_bounds = array<i64: 128, 128>}, {pipeline_mode = #tpu.pipeline_mode<synchronous>, transform_indices = @transform_8, window_bounds = array<i64: 1, 128>}, {transform_indices = @transform_9, window_bounds = array<i64: 128, 128>}]} {
    %c0 = arith.constant 0 : index
    %c0_0 = arith.constant 0 : index
    %0 = vector.load %arg1[%c0, %c0_0] : memref<128x16xf32, #tpu.memory_space<vmem>>, vector<128x16xf32>
    %1 = arith.truncf %0 : vector<128x16xf32> to vector<128x16xbf16>
    %c0_1 = arith.constant 0 : index
    %c0_2 = arith.constant 0 : index
    %2 = vector.load %arg2[%c0_1, %c0_2] : memref<128x8xf32, #tpu.memory_space<vmem>>, vector<128x8xf32>
    %3 = arith.truncf %2 : vector<128x8xf32> to vector<128x8xbf16>
    %c0_3 = arith.constant 0 : index
    %c0_4 = arith.constant 0 : index
    %4 = vector.load %arg3[%c0_3, %c0_4] : memref<16x128xbf16, #tpu.memory_space<vmem>>, vector<16x128xbf16>
    %cst = arith.constant dense<0.000000e+00> : vector<128x128xf32>
    %5 = tpu.matmul %1, %4, %cst {dimension_numbers = #tpu.dot_dimension_numbers<[1], [0], [0], [1], [0, 0, 1, 1], [], []>} : vector<128x16xbf16>, vector<16x128xbf16>, vector<128x128xf32> -> vector<128x128xf32>
    %c0_5 = arith.constant 0 : index
    %c0_6 = arith.constant 0 : index
    %6 = vector.load %arg4[%c0_5, %c0_6] : memref<8x128xbf16, #tpu.memory_space<vmem>>, vector<8x128xbf16>
    %cst_7 = arith.constant dense<0.000000e+00> : vector<128x128xf32>
    %7 = tpu.matmul %3, %6, %cst_7 {dimension_numbers = #tpu.dot_dimension_numbers<[1], [0], [0], [1], [0, 0, 1, 1], [], []>} : vector<128x8xbf16>, vector<8x128xbf16>, vector<128x128xf32> -> vector<128x128xf32>
    %8 = arith.addf %5, %7 : vector<128x128xf32>
    %c0_8 = arith.constant 0 : index
    %c0_9 = arith.constant 0 : index
    %9 = vector.load %arg5[%c0_8, %c0_9] : memref<1x128xf32, #tpu.memory_space<vmem>>, vector<1x128xf32>
    %10 = vector.broadcast %9 : vector<1x128xf32> to vector<128x128xf32>
    %11 = arith.addf %8, %10 : vector<128x128xf32>
    %cst_10 = arith.constant 0.000000e+00 : f32
    %12 = vector.broadcast %cst_10 : f32 to vector<128x128xf32>
    %13 = arith.maximumf %11, %12 : vector<128x128xf32>
    %14 = arith.truncf %13 : vector<128x128xf32> to vector<128x128xbf16>
    %c0_11 = arith.constant 0 : index
    %c0_12 = arith.constant 0 : index
    %15 = vector.load %arg6[%c0_11, %c0_12] : memref<128x128xbf16, #tpu.memory_space<vmem>>, vector<128x128xbf16>
    %cst_13 = arith.constant dense<0.000000e+00> : vector<128x128xf32>
    %16 = tpu.matmul %14, %15, %cst_13 {dimension_numbers = #tpu.dot_dimension_numbers<[1], [0], [0], [1], [0, 0, 1, 1], [], []>} : vector<128x128xbf16>, vector<128x128xbf16>, vector<128x128xf32> -> vector<128x128xf32>
    %c0_14 = arith.constant 0 : index
    %c0_15 = arith.constant 0 : index
    %17 = vector.load %arg7[%c0_14, %c0_15] : memref<1x128xf32, #tpu.memory_space<vmem>>, vector<1x128xf32>
    %18 = vector.broadcast %17 : vector<1x128xf32> to vector<128x128xf32>
    %19 = arith.addf %16, %18 : vector<128x128xf32>
    %cst_16 = arith.constant 0.000000e+00 : f32
    %20 = vector.broadcast %cst_16 : f32 to vector<128x128xf32>
    %21 = arith.maximumf %19, %20 : vector<128x128xf32>
    %22 = arith.truncf %21 : vector<128x128xf32> to vector<128x128xbf16>
    %c0_17 = arith.constant 0 : index
    %c0_18 = arith.constant 0 : index
    %23 = vector.load %arg8[%c0_17, %c0_18] : memref<128x128xbf16, #tpu.memory_space<vmem>>, vector<128x128xbf16>
    %cst_19 = arith.constant dense<0.000000e+00> : vector<128x128xf32>
    %24 = tpu.matmul %22, %23, %cst_19 {dimension_numbers = #tpu.dot_dimension_numbers<[1], [0], [0], [1], [0, 0, 1, 1], [], []>} : vector<128x128xbf16>, vector<128x128xbf16>, vector<128x128xf32> -> vector<128x128xf32>
    %c0_20 = arith.constant 0 : index
    %c0_21 = arith.constant 0 : index
    %25 = vector.load %arg9[%c0_20, %c0_21] : memref<1x128xf32, #tpu.memory_space<vmem>>, vector<1x128xf32>
    %26 = vector.broadcast %25 : vector<1x128xf32> to vector<128x128xf32>
    %27 = arith.addf %24, %26 : vector<128x128xf32>
    %28 = arith.truncf %27 : vector<128x128xf32> to vector<128x128xbf16>
    %c0_22 = arith.constant 0 : index
    %c0_23 = arith.constant 0 : index
    %29 = vector.load %arg10[%c0_22, %c0_23] : memref<128x128xbf16, #tpu.memory_space<vmem>>, vector<128x128xbf16>
    tpu.vector_store %arg10[%c0_22, %c0_23], %28 {strides = array<i32>} : memref<128x128xbf16, #tpu.memory_space<vmem>>, vector<128x128xbf16>,
    return
  }
  func.func @transform_0(%arg0: i32) -> (i32, i32) {
    %c0_i32 = arith.constant 0 : i32
    %c0_i32_0 = arith.constant 0 : i32
    return %arg0, %c0_i32 : i32, i32
  }
  func.func @transform_1(%arg0: i32) -> (i32, i32) {
    %c0_i32 = arith.constant 0 : i32
    %c0_i32_0 = arith.constant 0 : i32
    return %arg0, %c0_i32 : i32, i32
  }
  func.func @transform_2(%arg0: i32) -> (i32, i32) {
    %c0_i32 = arith.constant 0 : i32
    %c0_i32_0 = arith.constant 0 : i32
    %c0_i32_1 = arith.constant 0 : i32
    return %c0_i32, %c0_i32_0 : i32, i32
  }
  func.func @transform_3(%arg0: i32) -> (i32, i32) {
    %c0_i32 = arith.constant 0 : i32
    %c0_i32_0 = arith.constant 0 : i32
    %c0_i32_1 = arith.constant 0 : i32
    return %c0_i32, %c0_i32_0 : i32, i32
  }
  func.func @transform_4(%arg0: i32) -> (i32, i32) {
    %c0_i32 = arith.constant 0 : i32
    %c0_i32_0 = arith.constant 0 : i32
    %c0_i32_1 = arith.constant 0 : i32
    return %c0_i32, %c0_i32_0 : i32, i32
  }
  func.func @transform_5(%arg0: i32) -> (i32, i32) {
    %c0_i32 = arith.constant 0 : i32
    %c0_i32_0 = arith.constant 0 : i32
    %c0_i32_1 = arith.constant 0 : i32
    return %c0_i32, %c0_i32_0 : i32, i32
  }
  func.func @transform_6(%arg0: i32) -> (i32, i32) {
    %c0_i32 = arith.constant 0 : i32
    %c0_i32_0 = arith.constant 0 : i32
    %c0_i32_1 = arith.constant 0 : i32
    return %c0_i32, %c0_i32_0 : i32, i32
  }
  func.func @transform_7(%arg0: i32) -> (i32, i32) {
    %c0_i32 = arith.constant 0 : i32
    %c0_i32_0 = arith.constant 0 : i32
    %c0_i32_1 = arith.constant 0 : i32
    return %c0_i32, %c0_i32_0 : i32, i32
  }
  func.func @transform_8(%arg0: i32) -> (i32, i32) {
    %c0_i32 = arith.constant 0 : i32
    %c0_i32_0 = arith.constant 0 : i32
    %c0_i32_1 = arith.constant 0 : i32
    return %c0_i32, %c0_i32_0 : i32, i32
  }
  func.func @transform_9(%arg0: i32) -> (i32, i32) {
    %c0_i32 = arith.constant 0 : i32
    %c0_i32_0 = arith.constant 0 : i32
    return %arg0, %c0_i32 : i32, i32
  }
}

</mosaic_0001>

<bundles_post_ra>
// kernel: _critic_forward.1
= control target key start
LH: loop header
LB: loop body
LE: loop exit
PB: predicated region body
PF: predicated region fallthrough
CT: control target
= control target key end

     0   :  { %14 = vsyncpa [#allocation3], 0  ;;  %s1790_s0 = inlined_call_operand.hbm [shape: f32[128,16], index: 0, kind: input, shape index: {}]   ;;  %s1791_s1 = inlined_call_operand.hbm [shape: f32[128,8], index: 1, kind: input, shape index: {}]   ;;  %s1792_s2 = inlined_call_operand.hbm [shape: bf16[16,128], index: 2, kind: input, shape index: {}]   ;;  %s1793_s3 = inlined_call_operand.hbm [shape: bf16[8,128], index: 3, kind: input, shape index: {}]   ;;  %s1794_s4 = inlined_call_operand.hbm [shape: f32[1,128], index: 4, kind: input, shape index: {}]   ;;  %s1795_s5 = inlined_call_operand.hbm [shape: bf16[128,128], index: 5, kind: input, shape index: {}]   ;;  %s1796_s6 = inlined_call_operand.hbm [shape: f32[1,128], index: 6, kind: input, shape index: {}]   ;;  %s1797_s7 = inlined_call_operand.hbm [shape: bf16[128,128], index: 7, kind: input, shape index: {}]   ;;  %s1798_s8 = inlined_call_operand.hbm [shape: f32[1,128], index: 8, kind: input, shape index: {}]   ;;  %s1799_s9 = inlined_call_operand.hbm [shape: bf16[128,128], index: 9, kind: output, shape index: {}]  }
   0x1   :  { %15 = vsyncpa [#allocation6], 0 }
   0x2   :  { %16 = vsyncpa [#allocation9], 0 }
   0x3   :  { %17 = vsyncpa [#allocation12], 0 }
   0x4   :  { %18 = vsyncpa [#allocation15], 0 }
   0x5   :  { %19 = vsyncpa [#allocation4], 0  ;;  %s1522_s30 = smov [#allocation5]   ;;  %s1523_s11 = smov [#allocation8]  }
   0x6   :  { %s37_s10 = sshll.u32 %s1522_s30, 4  ;;  %s62_s12 = sshll.u32 %s1523_s11, 4  ;;  %s38_s10 = int_to_ptr.vmem [resolvable:$true] %s37_s10  ;;  %s63_s12 = int_to_ptr.vmem [resolvable:$true] %s62_s12 }
   0x7   :  { %s1290_s15 = scalar_lea.hbm %s1791_s1, 2048 }
   0x8   :  { %p1291_p0 = scmp.ne.s32.totalorder %s1791_s1, %s1290_s15  ;;  %p1294_p1 = scmp.lt.u32.totalorder %s1290_s15, %s1791_s1 }
   0xa   :  { %p1296_p2 = pnand %p1294_p1, %p1291_p0 }
   0xc   :  { %1299 = shalt.err (!%p1296_p2)
}
   0xd   :  { %s1300_s20 = scalar_lea.vmem %s38_s10, 2048  ;;  %p1305_p4 = scmp.lt.s32.totalorder %s38_s10, %s38_s10 }
   0xe   :  { %p1301_p3 = scmp.ne.s32.totalorder %s38_s10, %s1300_s20  ;;  %p1306_p5 = scmp.lt.s32.totalorder %s1300_s20, %s1300_s20 }
  0x10   :  { %p1307_p6 = por %p1306_p5, %p1305_p4 }
  0x12   :  { %p1308_p7 = pnand %p1307_p6, %p1301_p3 }
  0x14   :  { %1311 = shalt.err (!%p1308_p7)
}
  0x15   :  { %s1524_s21 = smov 128   ;;  %s1525_s22 = smov 8  }
  0x16   :  { %43 = dma.hbm_to_vmem [thread:$0]  %s1791_s1, 2048, %s38_s10, [#allocation6], %s1524_s21, %s1524_s21, %s1525_s22  }
  0x17   :  { %s1312_s27 = scalar_lea.hbm %s1793_s3, 64 }
  0x18   :  { %p1313_p8 = scmp.ne.s32.totalorder %s1793_s3, %s1312_s27  ;;  %p1316_p9 = scmp.lt.u32.totalorder %s1312_s27, %s1793_s3 }
  0x1a   :  { %p1318_p10 = pnand %p1316_p9, %p1313_p8 }
  0x1c   :  { %1321 = shalt.err (!%p1318_p10)
}
  0x1d   :  { %s1322_s13 = scalar_lea.vmem %s63_s12, 64  ;;  %p1327_p12 = scmp.lt.s32.totalorder %s63_s12, %s63_s12 }
  0x1e   :  { %p1323_p11 = scmp.ne.s32.totalorder %s63_s12, %s1322_s13  ;;  %p1328_p13 = scmp.lt.s32.totalorder %s1322_s13, %s1322_s13 }
  0x20   :  { %p1329_p0 = por %p1328_p13, %p1327_p12 }
  0x22   :  { %p1330_p1 = pnand %p1329_p0, %p1323_p11 }
  0x24   :  { %1333 = shalt.err (!%p1330_p1)
}
  0x25   :  { %65 = dma.hbm_to_vmem [thread:$0]  %s1793_s3, 64, %s63_s12, [#allocation9]  }
  0x26   :  { %s1526_s14 = smov [#allocation11]   ;;  %s1527_s16 = smov [#allocation14]  }
  0x27   :  { %s81_s15 = sshll.u32 %s1526_s14, 4  ;;  %s103_s17 = sshll.u32 %s1527_s16, 4  ;;  %s82_s15 = int_to_ptr.vmem [resolvable:$true] %s81_s15  ;;  %s1613_s17 = int_to_ptr.vmem [resolvable:$true] %s103_s17 }
  0x28   :  { %s1334_s20 = scalar_lea.hbm %s1795_s5, 1024 }
  0x29   :  { %p1335_p2 = scmp.ne.s32.totalorder %s1795_s5, %s1334_s20  ;;  %p1338_p3 = scmp.lt.u32.totalorder %s1334_s20, %s1795_s5 }
  0x2b   :  { %p1340_p4 = pnand %p1338_p3, %p1335_p2 }
  0x2d   :  { %1343 = shalt.err (!%p1340_p4)
}
  0x2e   :  { %s1344_s3 = scalar_lea.vmem %s82_s15, 1024  ;;  %p1349_p6 = scmp.lt.s32.totalorder %s82_s15, %s82_s15 }
  0x2f   :  { %p1345_p5 = scmp.ne.s32.totalorder %s82_s15, %s1344_s3  ;;  %p1350_p7 = scmp.lt.s32.totalorder %s1344_s3, %s1344_s3 }
  0x31   :  { %p1351_p8 = por %p1350_p7, %p1349_p6 }
  0x33   :  { %p1352_p9 = pnand %p1351_p8, %p1345_p5 }
  0x35   :  { %1355 = shalt.err (!%p1352_p9)
}
  0x36   :  { %s1528_s12 = smov 64   ;;  %s1529_s27 = smov 4  }
  0x37   :  { %87 = dma.hbm_to_vmem [thread:$0]  %s1795_s5, 1024, %s82_s15, [#allocation12], %s1528_s12, %s1528_s12, %s1529_s27  }
  0x38   :  { %s1356_s13 = scalar_lea.hbm %s1797_s7, 1024 }
  0x39   :  { %p1357_p10 = scmp.ne.s32.totalorder %s1797_s7, %s1356_s13  ;;  %p1360_p11 = scmp.lt.u32.totalorder %s1356_s13, %s1797_s7 }
  0x3b   :  { %p1362_p12 = pnand %p1360_p11, %p1357_p10 }
  0x3d   :  { %1365 = shalt.err (!%p1362_p12)
}
  0x3e   :  { %s1366_s18 = scalar_lea.vmem %s1613_s17, 1024  ;;  %p1371_p0 = scmp.lt.s32.totalorder %s1613_s17, %s1613_s17 }
  0x3f   :  { %p1367_p13 = scmp.ne.s32.totalorder %s1613_s17, %s1366_s18  ;;  %p1372_p1 = scmp.lt.s32.totalorder %s1366_s18, %s1366_s18 }
  0x41   :  { %p1373_p2 = por %p1372_p1, %p1371_p0 }
  0x43   :  { %p1374_p3 = pnand %p1373_p2, %p1367_p13 }
  0x45   :  { %1377 = shalt.err (!%p1374_p3)
}
  0x46   :  { %109 = dma.hbm_to_vmem [thread:$0]  %s1797_s7, 1024, %s1613_s17, [#allocation15], %s1528_s12, %s1528_s12, %s1529_s27  }
  0x47   :  { %s1530_s19 = smov [#allocation2]   ;;  %s1531_s23 = smov [#allocation7]  }
  0x48   :  { %s25_s20 = sshll.u32 %s1530_s19, 4  ;;  %s49_s24 = sshll.u32 %s1531_s23, 4  ;;  %s26_s20 = int_to_ptr.vmem [resolvable:$true] %s25_s20  ;;  %s1650_s24 = int_to_ptr.vmem [resolvable:$true] %s49_s24 }
  0x49   :  { %s1378_s3 = scalar_lea.hbm %s1790_s0, 2048 }
  0x4a   :  { %p1379_p4 = scmp.ne.s32.totalorder %s1790_s0, %s1378_s3  ;;  %p1382_p5 = scmp.lt.u32.totalorder %s1378_s3, %s1790_s0 }
  0x4c   :  { %p1384_p6 = pnand %p1382_p5, %p1379_p4 }
  0x4e   :  { %1387 = shalt.err (!%p1384_p6)
}
  0x4f   :  { %s1388_s7 = scalar_lea.vmem %s26_s20, 2048  ;;  %p1393_p8 = scmp.lt.s32.totalorder %s26_s20, %s26_s20 }
  0x50   :  { %p1389_p7 = scmp.ne.s32.totalorder %s26_s20, %s1388_s7  ;;  %p1394_p9 = scmp.lt.s32.totalorder %s1388_s7, %s1388_s7 }
  0x52   :  { %p1395_p10 = por %p1394_p9, %p1393_p8 }
  0x54   :  { %p1396_p11 = pnand %p1395_p10, %p1389_p7 }
  0x56   :  { %1399 = shalt.err (!%p1396_p11)
}
  0x57   :  { %31 = dma.hbm_to_vmem [thread:$0]  %s1790_s0, 2048, %s26_s20, [#allocation3], %s1524_s21, %s1524_s21, %s1525_s22  }
  0x58   :  { %s1400_s14 = scalar_lea.hbm %s1792_s2, 128 }
  0x59   :  { %p1401_p12 = scmp.ne.s32.totalorder %s1792_s2, %s1400_s14  ;;  %p1404_p13 = scmp.lt.u32.totalorder %s1400_s14, %s1792_s2 }
  0x5b   :  { %p1406_p0 = pnand %p1404_p13, %p1401_p12 }
  0x5d   :  { %1409 = shalt.err (!%p1406_p0)
}
  0x5e   :  { %s1410_s19 = scalar_lea.vmem %s1650_s24, 128  ;;  %p1415_p2 = scmp.lt.s32.totalorder %s1650_s24, %s1650_s24 }
  0x5f   :  { %p1411_p1 = scmp.ne.s32.totalorder %s1650_s24, %s1410_s19  ;;  %p1416_p3 = scmp.lt.s32.totalorder %s1410_s19, %s1410_s19 }
  0x61   :  { %p1417_p4 = por %p1416_p3, %p1415_p2 }
  0x63   :  { %p1418_p5 = pnand %p1417_p4, %p1411_p1 }
  0x65   :  { %1421 = shalt.err (!%p1418_p5)
}
  0x66   :  { %55 = dma.hbm_to_vmem [thread:$0]  %s1792_s2, 128, %s1650_s24, [#allocation6], %s1528_s12, %s1528_s12, %s1529_s27  }
  0x67   :  { %s1532_s22 = smov [#allocation10]   ;;  %s1533_s23 = smov [#allocation13]  }
  0x68   :  { %s72_s20 = sshll.u32 %s1532_s22, 4  ;;  %s94_s25 = sshll.u32 %s1533_s23, 4  ;;  %s73_s20 = int_to_ptr.vmem [resolvable:$true] %s72_s20  ;;  %s95_s25 = int_to_ptr.vmem [resolvable:$true] %s94_s25 }
  0x69   :  { %s1422_s28 = scalar_lea.hbm %s1794_s4, 16 }
  0x6a   :  { %p1423_p6 = scmp.ne.s32.totalorder %s1794_s4, %s1422_s28  ;;  %p1426_p7 = scmp.lt.u32.totalorder %s1422_s28, %s1794_s4 }
  0x6c   :  { %p1428_p8 = pnand %p1426_p7, %p1423_p6 }
  0x6e   :  { %1431 = shalt.err (!%p1428_p8)
}
  0x6f   :  { %s1432_s2 = scalar_lea.vmem %s73_s20, 16  ;;  %s1436_s24 = scalar_lea.vmem %s73_s20, 32 }
  0x70   :  { %p1433_p9 = scmp.ne.s32.totalorder %s73_s20, %s1432_s2  ;;  %p1437_p10 = scmp.lt.s32.totalorder %s73_s20, %s73_s20 }
  0x71   :  { %p1438_p11 = scmp.lt.s32.totalorder %s1436_s24, %s1432_s2 }
  0x73   :  { %p1439_p12 = por %p1438_p11, %p1437_p10 }
  0x75   :  { %p1440_p13 = pnand %p1439_p12, %p1433_p9 }
  0x77   :  { %1443 = shalt.err (!%p1440_p13)
}
  0x78   :  { %75 = dma.hbm_to_vmem [thread:$0]  %s1794_s4, 16, %s73_s20, [#allocation9]  }
  0x79   :  { %s1444_s14 = scalar_lea.hbm %s1796_s6, 16 }
  0x7a   :  { %p1445_p0 = scmp.ne.s32.totalorder %s1796_s6, %s1444_s14  ;;  %p1448_p1 = scmp.lt.u32.totalorder %s1444_s14, %s1796_s6 }
  0x7c   :  { %p1450_p2 = pnand %p1448_p1, %p1445_p0 }
  0x7e   :  { %1453 = shalt.err (!%p1450_p2)
}
  0x7f   :  { %s1454_s19 = scalar_lea.vmem %s95_s25, 16  ;;  %s1458_s0 = scalar_lea.vmem %s95_s25, 32 }
  0x80   :  { %p1455_p3 = scmp.ne.s32.totalorder %s95_s25, %s1454_s19  ;;  %p1459_p4 = scmp.lt.s32.totalorder %s95_s25, %s95_s25 }
  0x81   :  { %p1460_p5 = scmp.lt.s32.totalorder %s1458_s0, %s1454_s19 }
  0x83   :  { %p1461_p6 = por %p1460_p5, %p1459_p4 }
  0x85   :  { %p1462_p7 = pnand %p1461_p6, %p1455_p3 }
  0x87   :  { %1465 = shalt.err (!%p1462_p7)
}
  0x88   :  { %97 = dma.hbm_to_vmem [thread:$0]  %s1796_s6, 16, %s95_s25, [#allocation12]  }
  0x89   :  { %s1534_s22 = smov [#allocation16]   ;;  %s1466_s3 = scalar_lea.hbm %s1798_s8, 16 }
  0x8a   :  { %s116_s20 = sshll.u32 %s1534_s22, 4  ;;  %p1467_p8 = scmp.ne.s32.totalorder %s1798_s8, %s1466_s3  ;;  %s117_s20 = int_to_ptr.vmem [resolvable:$true] %s116_s20 }
  0x8b   :  { %p1470_p9 = scmp.lt.u32.totalorder %s1466_s3, %s1798_s8 }
  0x8d   :  { %p1472_p10 = pnand %p1470_p9, %p1467_p8 }
  0x8f   :  { %1475 = shalt.err (!%p1472_p10)
}
  0x90   :  { %s1476_s7 = scalar_lea.vmem %s117_s20, 16  ;;  %s1480_s6 = scalar_lea.vmem %s117_s20, 32 }
  0x91   :  { %p1477_p11 = scmp.ne.s32.totalorder %s117_s20, %s1476_s7  ;;  %p1481_p12 = scmp.lt.s32.totalorder %s117_s20, %s117_s20 }
  0x92   :  { %p1482_p13 = scmp.lt.s32.totalorder %s1480_s6, %s1476_s7 }
  0x94   :  { %p1483_p0 = por %p1482_p13, %p1481_p12 }
  0x96   :  { %p1484_p1 = pnand %p1483_p0, %p1477_p11 }
  0x98   :  { %1487 = shalt.err (!%p1484_p1)
}
  0x99   :  { %119 = dma.hbm_to_vmem [thread:$0]  %s1798_s8, 16, %s117_s20, [#allocation15]  }
  0x9a   :  { %1510 = dma.done.wait [#allocation3], 2048  }
  0x9b   :  { %1511 = vsyncadd [#allocation3], 4294965248 }
  0x9c   :  { %1512 = dma.done.wait [#allocation6], 2176  }
  0x9d   :  { %1513 = vsyncadd [#allocation6], 4294965120 }
  0x9e   :  { %1514 = dma.done.wait [#allocation9], 80  }
  0x9f   :  { %1515 = vsyncadd [#allocation9], 4294967216 }
  0xa0   :  { %1516 = dma.done.wait [#allocation12], 1040  }
  0xa1   :  { %1517 = vsyncadd [#allocation12], 4294966256 }
  0xa2   :  { %1518 = dma.done.wait [#allocation15], 1040  }
  0xa3   :  { %1519 = vsyncadd [#allocation15], 4294966256  ;;  %vm224_vm0 = vcmask 1043456   ;;  %v198_v0 = vld [vmem:[#allocation8] sm:$0xf]  ;;  %v172_v1 = vld [vmem:[#allocation5] sm:$0xff] }
  0xa4   :  { %v173_v2 = vld [vmem:[#allocation5 + $0x8] sm:$0xff]  ;;  %vm199_vm1 = vcmask 64512   ;;  %1258 = vmatprep.subr.msk.bf16.mxu0 %vm224_vm0, %v198_v0  ;;  %v226_v3 = vsel %vm224_vm0, %v198_v0, 0  ;;  %v174_v5 = vld [vmem:[#allocation5 + $0x10] sm:$0xff]  ;;  %v175_v6 = vld [vmem:[#allocation5 + $0x18] sm:$0xff]  ;;  %vm331_vm2 = vcmask 130048  }
  0xa5   :  { %v188_v4 = vpack.c.bf16 %v173_v2, %v172_v1  ;;  %1127 = vmatpush3.bf16.msra.mxu0 %v226_v3  ;;  %v189_v7 = vpack.c.bf16 %v175_v6, %v174_v5  ;;  %v1273_v8 = vld [vmem:[#allocation7] sm:$0xff]   ;;  %v177_v10 = vld [vmem:[#allocation5 + $0x28] sm:$0xff]  ;;  %v178_v12 = vld [vmem:[#allocation5 + $0x30] sm:$0xff]  ;;  %s1535_s8 = smov [#allocation17]  }
  0xa6   :  { %v176_v9 = vld [vmem:[#allocation5 + $0x20] sm:$0xff]  ;;  %1144 = vmatprep.subr.bf16.mxu0 %v1273_v8  ;;  %v179_v13 = vld [vmem:[#allocation5 + $0x38] sm:$0xff]  ;;  %v181_v15 = vld [vmem:[#allocation5 + $0x48] sm:$0xff]  ;;  %s945_s24 = sshll.u32 %s1535_s8, 4  ;;  %s946_s24 = int_to_ptr.vmem [resolvable:$true] %s945_s24 }
  0xa7   :  { %1128 = vmatprep.mubr.msk.bf16.mxu0 %vm199_vm1, %v188_v4  ;;  %v190_v11 = vpack.c.bf16 %v177_v10, %v176_v9  ;;  %v180_v14 = vld [vmem:[#allocation5 + $0x40] sm:$0xff]  ;;  %v191_v16 = vpack.c.bf16 %v179_v13, %v178_v12  ;;  %v182_v18 = vld [vmem:[#allocation5 + $0x50] sm:$0xff]  ;;  %v183_v19 = vld [vmem:[#allocation5 + $0x58] sm:$0xff]  ;;  %s1488_s17 = scalar_lea.vmem %s946_s24, 1024  ;;  %p1493_p3 = scmp.lt.s32.totalorder %s946_s24, %s946_s24 }
  0xa8   :  { %1129 = vmatmul.mubr.msk.bf16.vlgmr.msra.gmra.mrb[0].mxu0 %vm199_vm1, %v189_v7  ;;  %v192_v17 = vpack.c.bf16 %v181_v15, %v180_v14  ;;  %v1274_v20 = vld [vmem:[#allocation11] sm:$0xff]   ;;  %v1275_v21 = vld [vmem:[#allocation11 + $0x8] sm:$0xff]   ;;  %v184_v22 = vld [vmem:[#allocation5 + $0x60] sm:$0xff]  ;;  %v193_v25 = vpack.c.bf16 %v183_v19, %v182_v18  ;;  %p1489_p2 = scmp.ne.s32.totalorder %s946_s24, %s1488_s17  ;;  %p1494_p4 = scmp.lt.s32.totalorder %s1488_s17, %s1488_s17 }
  0xa9   :  { %1145 = vmatpush3.bf16.msra.mxu0 %v1273_v8  ;;  %1132 = vmatprep.mubr.msk.bf16.mxu0 %vm199_vm1, %v190_v11  ;;  %v185_v23 = vld [vmem:[#allocation5 + $0x68] sm:$0xff]  ;;  %v1276_v24 = vld [vmem:[#allocation11 + $0x10] sm:$0xff]   ;;  %v186_v28 = vld [vmem:[#allocation5 + $0x70] sm:$0xff] }
  0xaa   :  { %1162 = vmatprep.subr.bf16.mxu1 %v1274_v20  ;;  %v194_v26 = vpack.c.bf16 %v185_v23, %v184_v22  ;;  %v1277_v27 = vld [vmem:[#allocation11 + $0x18] sm:$0xff]   ;;  %v187_v29 = vld [vmem:[#allocation5 + $0x78] sm:$0xff]  ;;  %v1278_v32 = vld [vmem:[#allocation11 + $0x20] sm:$0xff]   ;;  %p1495_p5 = por %p1494_p4, %p1493_p3 }
  0xab   :  { %1163 = vmatpush3.bf16.msra.mxu1 %v1274_v20  ;;  %v148_v30 = vld [vmem:[#allocation2] sm:$0xff]  ;;  %v149_v31 = vld [vmem:[#allocation2 + $0x8] sm:$0xff]  ;;  %v195_v33 = vpack.c.bf16 %v187_v29, %v186_v28  ;;  %v1279_v35 = vld [vmem:[#allocation11 + $0x28] sm:$0xff]  }
  0xac   :  { %1164 = vmatprep.subr.bf16.mxu1 %v1275_v21  ;;  %v164_v34 = vpack.c.bf16 %v149_v31, %v148_v30  ;;  %v150_v36 = vld [vmem:[#allocation2 + $0x10] sm:$0xff]  ;;  %v151_v37 = vld [vmem:[#allocation2 + $0x18] sm:$0xff]  ;;  %v152_v38 = vld [vmem:[#allocation2 + $0x20] sm:$0xff]  ;;  %p1496_p6 = pnand %p1495_p5, %p1489_p2 }
  0xad   :  { %v153_v39 = vld [vmem:[#allocation2 + $0x28] sm:$0xff]  ;;  %v165_v40 = vpack.c.bf16 %v151_v37, %v150_v36  ;;  %v154_v42 = vld [vmem:[#allocation2 + $0x30] sm:$0xff]  ;;  %v155_v43 = vld [vmem:[#allocation2 + $0x38] sm:$0xff] }
  0xae   :  { %v166_v41 = vpack.c.bf16 %v153_v39, %v152_v38  ;;  %v156_v44 = vld [vmem:[#allocation2 + $0x40] sm:$0xff]  ;;  %v157_v45 = vld [vmem:[#allocation2 + $0x48] sm:$0xff]  ;;  %v167_v46 = vpack.c.bf16 %v155_v43, %v154_v42  ;;  %v158_v48 = vld [vmem:[#allocation2 + $0x50] sm:$0xff] }
  0xaf   :  { %1165 = vmatpush3.bf16.msra.mxu1 %v1275_v21  ;;  %v168_v47 = vpack.c.bf16 %v157_v45, %v156_v44  ;;  %v159_v49 = vld [vmem:[#allocation2 + $0x58] sm:$0xff]  ;;  %v160_v50 = vld [vmem:[#allocation2 + $0x60] sm:$0xff]  ;;  %v161_v51 = vld [vmem:[#allocation2 + $0x68] sm:$0xff] }
  0xb0   :  { %1133 = vmatmul.mubr.msk.bf16.gmra.mrb[4].mxu0 %vm199_vm1, %v191_v16  ;;  %1166 = vmatprep.subr.bf16.mxu1 %v1276_v24  ;;  %v169_v52 = vpack.c.bf16 %v159_v49, %v158_v48  ;;  %v170_v53 = vpack.c.bf16 %v161_v51, %v160_v50  ;;  %v162_v54 = vld [vmem:[#allocation2 + $0x70] sm:$0xff]  ;;  %v163_v55 = vld [vmem:[#allocation2 + $0x78] sm:$0xff]  ;;  %v1281_v58 = vld [vmem:[#allocation11 + $0x38] sm:$0xff]  }
  0xb1   :  { %1136 = vmatprep.mubr.msk.bf16.mxu0 %vm199_vm1, %v192_v17  ;;  %v171_v56 = vpack.c.bf16 %v163_v55, %v162_v54  ;;  %v1280_v57 = vld [vmem:[#allocation11 + $0x30] sm:$0xff]   ;;  %v1282_v59 = vld [vmem:[#allocation14] sm:$0xff]   ;;  %v1739_v62 = vld [vmem:[#allocation14 + $0x18] sm:$0xff]  }
  0xb2   :  { %v1283_v60 = vld [vmem:[#allocation14 + $0x8] sm:$0xff]   ;;  %1194 = vmatprep.subr.bf16.mxu0 %v1282_v59  ;;  %v1284_v61 = vld [vmem:[#allocation14 + $0x10] sm:$0xff]   ;;  %v1742_v63 = vld [vmem:[#allocation14 + $0x20] sm:$0xff]  }
  0xb3   :  { %1167 = vmatpush3.bf16.msra.mxu1 %v1276_v24  ;;  %v1746_v0 = vld [vmem:[#allocation14 + $0x28] sm:$0xff]   ;;  %v1751_v1 = vld [vmem:[#allocation10] ss:$0 sm:$0xff] }
  0xb4   :  { %1168 = vmatprep.subr.bf16.mxu1 %v1277_v27 }
  0xb7   :  { %1169 = vmatpush3.bf16.msra.mxu1 %v1277_v27 }
  0xb8   :  { %1137 = vmatmul.mubr.msk.bf16.gmra.mrb[8].mxu0 %vm199_vm1, %v193_v25  ;;  %1170 = vmatprep.subr.bf16.mxu1 %v1278_v32 }
  0xb9   :  { %1140 = vmatprep.mubr.msk.bf16.mxu0 %vm199_vm1, %v194_v26 }
  0xbb   :  { %1171 = vmatpush3.bf16.msra.mxu1 %v1278_v32 }
  0xbc   :  { %1172 = vmatprep.subr.bf16.mxu1 %v1279_v35 }
  0xbf   :  { %1173 = vmatpush3.bf16.msra.mxu1 %v1279_v35 }
  0xc0   :  { %1141 = vmatmul.mubr.msk.bf16.gmra.mrb[12].mxu0 %vm199_vm1, %v195_v33  ;;  %1174 = vmatprep.subr.bf16.mxu1 %v1280_v57 }
  0xc1   :  { %1146 = vmatprep.mubr.msk.bf16.mxu0 %vm331_vm2, %v164_v34 }
  0xc3   :  { %1175 = vmatpush3.bf16.msra.mxu1 %v1280_v57 }
  0xc4   :  { %1176 = vmatprep.subr.bf16.mxu1 %v1281_v58 }
  0xc7   :  { %1177 = vmatpush3.bf16.msra.mxu1 %v1281_v58  ;;  %v1288_v58 = vld [vmem:[#allocation14 + $0x30] sm:$0xff]  }
  0xc8   :  { %1147 = vmatmul.mubr.msk.bf16.vlgmr.msra.gmra.mrb[0].mxu0 %vm331_vm2, %v165_v40  ;;  %1226 = vmatprep.subr.bf16.mxu1 %v1282_v59 }
  0xc9   :  { %1150 = vmatprep.mubr.msk.bf16.mxu0 %vm331_vm2, %v166_v41  ;;  %1195 = vmatpush3.bf16.msra.mxu0 %v1282_v59 }
  0xca   :  { %1196 = vmatprep.subr.bf16.mxu0 %v1283_v60 }
  0xcd   :  { %1197 = vmatpush3.bf16.msra.mxu0 %v1283_v60 }
  0xce   :  { %1198 = vmatprep.subr.bf16.mxu0 %v1284_v61 }
  0xd0   :  { %1151 = vmatmul.mubr.msk.bf16.gmra.mrb[4].mxu0 %vm331_vm2, %v167_v46 }
  0xd1   :  { %1154 = vmatprep.mubr.msk.bf16.mxu0 %vm331_vm2, %v168_v47  ;;  %1199 = vmatpush3.bf16.msra.mxu0 %v1284_v61 }
  0xd2   :  { %1200 = vmatprep.subr.bf16.mxu0 %v1739_v62 }
  0xd5   :  { %1201 = vmatpush3.bf16.msra.mxu0 %v1739_v62 }
  0xd6   :  { %1202 = vmatprep.subr.bf16.mxu0 %v1742_v63 }
  0xd8   :  { %1155 = vmatmul.mubr.msk.bf16.gmra.mrb[8].mxu0 %vm331_vm2, %v169_v52 }
  0xd9   :  { %1158 = vmatprep.mubr.msk.bf16.mxu0 %vm331_vm2, %v170_v53  ;;  %1203 = vmatpush3.bf16.msra.mxu0 %v1742_v63 }
  0xda   :  { %1204 = vmatprep.subr.bf16.mxu0 %v1746_v0 }
  0xdd   :  { %1205 = vmatpush3.bf16.msra.mxu0 %v1746_v0 }
  0xde   :  { %1206 = vmatprep.subr.bf16.mxu0 %v1288_v58 }
  0xe0   :  { %1159 = vmatmul.mubr.msk.bf16.gmra.mrb[12].mxu0 %vm331_vm2, %v171_v56 }
  0xe1   :  { %1207 = vmatpush3.bf16.msra.mxu0 %v1288_v58 }
 0x19b   :  { %v1148_v2 = vpop.f32.mrb[0].mxu0 }
 0x19c   :  { %v462_v3 = vadd.f32 %v1148_v2, %v1751_v1  ;;  %v390_v4 = vpop.f32.mrb[1].mxu0 }
 0x19d   :  { %v460_v5 = vadd.f32 %v1751_v1, %v390_v4  ;;  %v1149_v6 = vpop.f32.mrb[2].mxu0 }
 0x19e   :  { %v463_v7 = vadd.f32 %v1149_v6, %v1751_v1  ;;  %v393_v8 = vpop.f32.mrb[3].mxu0  ;;  %v478_v10 = vmax.f32 %v462_v3, 0.0 }
 0x19f   :  { %v461_v9 = vadd.f32 %v1751_v1, %v393_v8  ;;  %v476_v12 = vmax.f32 %v460_v5, 0.0 }
 0x1a0   :  { %v479_v11 = vmax.f32 %v463_v7, 0.0 }
 0x1a1   :  { %v477_v13 = vmax.f32 %v461_v9, 0.0 }
 0x1a2   :  { %v493_v14 = vpack.c.bf16 %v479_v11, %v478_v10 }
 0x1a3   :  { %v1152_v15 = vpop.f32.mrb[4].mxu0  ;;  %v492_v16 = vpack.c.bf16 %v477_v13, %v476_v12 }
 0x1a4   :  { %v466_v17 = vadd.f32 %v1152_v15, %v1751_v1  ;;  %v406_v18 = vpop.f32.mrb[5].mxu0 }
 0x1a5   :  { %v464_v19 = vadd.f32 %v1751_v1, %v406_v18  ;;  %v1153_v20 = vpop.f32.mrb[6].mxu0  ;;  %1178 = vmatprep.mubr.bf16.mxu1 %v492_v16 }
 0x1a6   :  { %v467_v21 = vadd.f32 %v1153_v20, %v1751_v1  ;;  %v409_v22 = vpop.f32.mrb[7].mxu0  ;;  %1179 = vmatmul.mubr.bf16.vlgmr.msra.gmra.mrb[0].mxu1 %v493_v14  ;;  %v482_v24 = vmax.f32 %v466_v17, 0.0 }
 0x1a7   :  { %v465_v23 = vadd.f32 %v1751_v1, %v409_v22  ;;  %1234 = vmatpush3.bf16.msra.mxu1 %v1282_v59  ;;  %v480_v26 = vmax.f32 %v464_v19, 0.0  ;;  %v1289_v59 = vld [vmem:[#allocation14 + $0x38] sm:$0xff]  }
 0x1a8   :  { %v483_v25 = vmax.f32 %v467_v21, 0.0  ;;  %1227 = vmatprep.subr.bf16.mxu1 %v1283_v60  ;;  %1208 = vmatprep.subr.bf16.mxu0 %v1289_v59 }
 0x1a9   :  { %v481_v27 = vmax.f32 %v465_v23, 0.0  ;;  %1209 = vmatpush3.bf16.msra.mxu0 %v1289_v59 }
 0x1aa   :  { %v495_v28 = vpack.c.bf16 %v483_v25, %v482_v24 }
 0x1ab   :  { %v494_v29 = vpack.c.bf16 %v481_v27, %v480_v26  ;;  %v1156_v30 = vpop.f32.mrb[8].mxu0  ;;  %1235 = vmatpush3.bf16.msra.mxu1 %v1283_v60  ;;  %v979_v60 = vld [vmem:[#allocation13] ss:$0 sm:$0xff] }
 0x1ac   :  { %v470_v31 = vadd.f32 %v1156_v30, %v1751_v1  ;;  %v422_v32 = vpop.f32.mrb[9].mxu0  ;;  %1228 = vmatprep.subr.bf16.mxu1 %v1284_v61 }
 0x1ad   :  { %v468_v33 = vadd.f32 %v1751_v1, %v422_v32  ;;  %v1157_v34 = vpop.f32.mrb[10].mxu0  ;;  %1182 = vmatprep.mubr.bf16.mxu1 %v494_v29 }
 0x1ae   :  { %v471_v35 = vadd.f32 %v1157_v34, %v1751_v1  ;;  %v425_v36 = vpop.f32.mrb[11].mxu0  ;;  %1183 = vmatmul.mubr.bf16.gmra.mrb[4].mxu1 %v495_v28  ;;  %v486_v38 = vmax.f32 %v470_v31, 0.0 }
 0x1af   :  { %v469_v37 = vadd.f32 %v1751_v1, %v425_v36  ;;  %1236 = vmatpush3.bf16.msra.mxu1 %v1284_v61  ;;  %v484_v40 = vmax.f32 %v468_v33, 0.0 }
 0x1b0   :  { %v487_v39 = vmax.f32 %v471_v35, 0.0  ;;  %1229 = vmatprep.subr.bf16.mxu1 %v1739_v62 }
 0x1b1   :  { %v485_v41 = vmax.f32 %v469_v37, 0.0 }
 0x1b2   :  { %v497_v42 = vpack.c.bf16 %v487_v39, %v486_v38 }
 0x1b3   :  { %v496_v43 = vpack.c.bf16 %v485_v41, %v484_v40  ;;  %v1160_v44 = vpop.f32.mrb[12].mxu0  ;;  %1237 = vmatpush3.bf16.msra.mxu1 %v1739_v62 }
 0x1b4   :  { %v474_v45 = vadd.f32 %v1160_v44, %v1751_v1  ;;  %v438_v46 = vpop.f32.mrb[13].mxu0  ;;  %1230 = vmatprep.subr.bf16.mxu1 %v1742_v63 }
 0x1b5   :  { %v472_v47 = vadd.f32 %v1751_v1, %v438_v46  ;;  %v1161_v48 = vpop.f32.mrb[14].mxu0  ;;  %1186 = vmatprep.mubr.bf16.mxu1 %v496_v43 }
 0x1b6   :  { %v475_v49 = vadd.f32 %v1161_v48, %v1751_v1  ;;  %v441_v50 = vpop.f32.mrb[15].mxu0  ;;  %1187 = vmatmul.mubr.bf16.gmra.mrb[8].mxu1 %v497_v42  ;;  %v490_v52 = vmax.f32 %v474_v45, 0.0 }
 0x1b7   :  { %v473_v51 = vadd.f32 %v1751_v1, %v441_v50  ;;  %1238 = vmatpush3.bf16.msra.mxu1 %v1742_v63  ;;  %v488_v54 = vmax.f32 %v472_v47, 0.0 }
 0x1b8   :  { %v491_v53 = vmax.f32 %v475_v49, 0.0  ;;  %1231 = vmatprep.subr.bf16.mxu1 %v1746_v0 }
 0x1b9   :  { %v489_v55 = vmax.f32 %v473_v51, 0.0 }
 0x1ba   :  { %v499_v56 = vpack.c.bf16 %v491_v53, %v490_v52 }
 0x1bb   :  { %v498_v57 = vpack.c.bf16 %v489_v55, %v488_v54  ;;  %1239 = vmatpush3.bf16.msra.mxu1 %v1746_v0  ;;  %v988_v54 = vld [vmem:[#allocation16] ss:$0 sm:$0xff] }
 0x1bc   :  { %1232 = vmatprep.subr.bf16.mxu1 %v1288_v58 }
 0x1bd   :  { %1190 = vmatprep.mubr.bf16.mxu1 %v498_v57 }
 0x1be   :  { %1191 = vmatmul.mubr.bf16.gmra.mrb[12].mxu1 %v499_v56 }
 0x1bf   :  { %1240 = vmatpush3.bf16.msra.mxu1 %v1288_v58 }
 0x1c0   :  { %1233 = vmatprep.subr.bf16.mxu1 %v1289_v59 }
 0x1c3   :  { %1241 = vmatpush3.bf16.msra.mxu1 %v1289_v59 }
 0x279   :  { %v1180_v61 = vpop.f32.mrb[0].mxu1 }
 0x27a   :  { %v614_v62 = vadd.f32 %v1180_v61, %v979_v60  ;;  %v605_v63 = vpop.f32.mrb[1].mxu1 }
 0x27b   :  { %v606_v1 = vadd.f32 %v979_v60, %v605_v63  ;;  %v1181_v2 = vpop.f32.mrb[2].mxu1 }
 0x27c   :  { %v617_v3 = vadd.f32 %v1181_v2, %v979_v60  ;;  %v608_v0 = vpop.f32.mrb[3].mxu1  ;;  %v670_v5 = vmax.f32 %v614_v62, 0.0 }
 0x27d   :  { %v609_v4 = vadd.f32 %v979_v60, %v608_v0  ;;  %v668_v7 = vmax.f32 %v606_v1, 0.0 }
 0x27e   :  { %v671_v6 = vmax.f32 %v617_v3, 0.0 }
 0x27f   :  { %v669_v8 = vmax.f32 %v609_v4, 0.0 }
 0x280   :  { %v685_v9 = vpack.c.bf16 %v671_v6, %v670_v5 }
 0x281   :  { %v684_v10 = vpack.c.bf16 %v669_v8, %v668_v7  ;;  %v1184_v11 = vpop.f32.mrb[4].mxu1 }
 0x282   :  { %v630_v12 = vadd.f32 %v1184_v11, %v979_v60  ;;  %v621_v13 = vpop.f32.mrb[5].mxu1 }
 0x283   :  { %v622_v14 = vadd.f32 %v979_v60, %v621_v13  ;;  %v1185_v15 = vpop.f32.mrb[6].mxu1  ;;  %1210 = vmatprep.mubr.bf16.mxu0 %v684_v10 }
 0x284   :  { %v633_v16 = vadd.f32 %v1185_v15, %v979_v60  ;;  %v624_v17 = vpop.f32.mrb[7].mxu1  ;;  %1211 = vmatmul.mubr.bf16.vlgmr.msra.gmra.mrb[16].mxu0 %v685_v9  ;;  %v674_v19 = vmax.f32 %v630_v12, 0.0 }
 0x285   :  { %v625_v18 = vadd.f32 %v979_v60, %v624_v17  ;;  %v672_v21 = vmax.f32 %v622_v14, 0.0 }
 0x286   :  { %v675_v20 = vmax.f32 %v633_v16, 0.0 }
 0x287   :  { %v673_v22 = vmax.f32 %v625_v18, 0.0 }
 0x288   :  { %v687_v23 = vpack.c.bf16 %v675_v20, %v674_v19 }
 0x289   :  { %v686_v24 = vpack.c.bf16 %v673_v22, %v672_v21  ;;  %v1188_v25 = vpop.f32.mrb[8].mxu1 }
 0x28a   :  { %v646_v26 = vadd.f32 %v1188_v25, %v979_v60  ;;  %v637_v27 = vpop.f32.mrb[9].mxu1 }
 0x28b   :  { %v638_v28 = vadd.f32 %v979_v60, %v637_v27  ;;  %v1189_v29 = vpop.f32.mrb[10].mxu1  ;;  %1214 = vmatprep.mubr.bf16.mxu1 %v686_v24 }
 0x28c   :  { %v649_v30 = vadd.f32 %v1189_v29, %v979_v60  ;;  %v640_v31 = vpop.f32.mrb[11].mxu1  ;;  %1215 = vmatmul.mubr.bf16.vlgmr.msra.gmra.mrb[16].mxu1 %v687_v23  ;;  %v678_v33 = vmax.f32 %v646_v26, 0.0 }
 0x28d   :  { %v641_v32 = vadd.f32 %v979_v60, %v640_v31  ;;  %v676_v35 = vmax.f32 %v638_v28, 0.0 }
 0x28e   :  { %v679_v34 = vmax.f32 %v649_v30, 0.0 }
 0x28f   :  { %v677_v36 = vmax.f32 %v641_v32, 0.0 }
 0x290   :  { %v689_v37 = vpack.c.bf16 %v679_v34, %v678_v33 }
 0x291   :  { %v688_v38 = vpack.c.bf16 %v677_v36, %v676_v35  ;;  %v1192_v39 = vpop.f32.mrb[12].mxu1 }
 0x292   :  { %v662_v40 = vadd.f32 %v1192_v39, %v979_v60  ;;  %v653_v41 = vpop.f32.mrb[13].mxu1 }
 0x293   :  { %v654_v42 = vadd.f32 %v979_v60, %v653_v41  ;;  %v1193_v43 = vpop.f32.mrb[14].mxu1  ;;  %1218 = vmatprep.mubr.bf16.mxu1 %v688_v38 }
 0x294   :  { %v665_v44 = vadd.f32 %v1193_v43, %v979_v60  ;;  %v656_v45 = vpop.f32.mrb[15].mxu1  ;;  %1219 = vmatmul.mubr.bf16.gmra.mrb[20].mxu1 %v689_v37  ;;  %v682_v47 = vmax.f32 %v662_v40, 0.0 }
 0x295   :  { %v657_v46 = vadd.f32 %v979_v60, %v656_v45  ;;  %v680_v49 = vmax.f32 %v654_v42, 0.0 }
 0x296   :  { %v683_v48 = vmax.f32 %v665_v44, 0.0 }
 0x297   :  { %v681_v50 = vmax.f32 %v657_v46, 0.0 }
 0x298   :  { %v691_v51 = vpack.c.bf16 %v683_v48, %v682_v47 }
 0x299   :  { %v690_v52 = vpack.c.bf16 %v681_v50, %v680_v49 }
 0x29b   :  { %1222 = vmatprep.mubr.bf16.mxu1 %v690_v52 }
 0x29c   :  { %1223 = vmatmul.mubr.bf16.gmra.mrb[24].mxu1 %v691_v51 }
 0x357   :  { %v1212_v53 = vpop.f32.mrb[16].mxu0 }
 0x358   :  { %v797_v55 = vpop.f32.mrb[17].mxu0  ;;  %v806_v57 = vadd.f32 %v1212_v53, %v988_v54 }
 0x359   :  { %v1213_v56 = vpop.f32.mrb[18].mxu0  ;;  %v798_v61 = vadd.f32 %v988_v54, %v797_v55 }
 0x35a   :  { %v809_v58 = vadd.f32 %v1213_v56, %v988_v54  ;;  %v800_v59 = vpop.f32.mrb[19].mxu0 }
 0x35b   :  { %v801_v62 = vadd.f32 %v988_v54, %v800_v59 }
 0x35c   :  { %v1037_v63 = vpack.c.bf16 %v809_v58, %v806_v57 }
 0x35d   :  { %v1032_v1 = vpack.c.bf16 %v801_v62, %v798_v61 }
 0x35e   :  { %1069 = vst [vmem:[#allocation17 + $0x8] sm:$0xff] %v1037_v63  }
 0x35f   :  { %1033 = vst [vmem:[#allocation17] sm:$0xff] %v1032_v1   ;;  %v1216_v60 = vpop.f32.mrb[16].mxu1 }
 0x360   :  { %v813_v2 = vpop.f32.mrb[17].mxu1  ;;  %v822_v0 = vadd.f32 %v1216_v60, %v988_v54 }
 0x361   :  { %v1217_v3 = vpop.f32.mrb[18].mxu1  ;;  %v814_v6 = vadd.f32 %v988_v54, %v813_v2 }
 0x362   :  { %v825_v4 = vadd.f32 %v1217_v3, %v988_v54  ;;  %v816_v5 = vpop.f32.mrb[19].mxu1 }
 0x363   :  { %v817_v7 = vadd.f32 %v988_v54, %v816_v5 }
 0x364   :  { %v1047_v8 = vpack.c.bf16 %v825_v4, %v822_v0 }
 0x365   :  { %v1042_v9 = vpack.c.bf16 %v817_v7, %v814_v6 }
 0x366   :  { %1071 = vst [vmem:[#allocation17 + $0x18] sm:$0xff] %v1047_v8  }
 0x367   :  { %1070 = vst [vmem:[#allocation17 + $0x10] sm:$0xff] %v1042_v9   ;;  %v1220_v10 = vpop.f32.mrb[20].mxu1 }
 0x368   :  { %v829_v11 = vpop.f32.mrb[21].mxu1  ;;  %v838_v13 = vadd.f32 %v1220_v10, %v988_v54 }
 0x369   :  { %v1221_v12 = vpop.f32.mrb[22].mxu1  ;;  %v830_v16 = vadd.f32 %v988_v54, %v829_v11 }
 0x36a   :  { %v841_v14 = vadd.f32 %v1221_v12, %v988_v54  ;;  %v832_v15 = vpop.f32.mrb[23].mxu1 }
 0x36b   :  { %v833_v17 = vadd.f32 %v988_v54, %v832_v15 }
 0x36c   :  { %v1057_v18 = vpack.c.bf16 %v841_v14, %v838_v13 }
 0x36d   :  { %v1052_v19 = vpack.c.bf16 %v833_v17, %v830_v16 }
 0x36e   :  { %1073 = vst [vmem:[#allocation17 + $0x28] sm:$0xff] %v1057_v18  }
 0x36f   :  { %1072 = vst [vmem:[#allocation17 + $0x20] sm:$0xff] %v1052_v19   ;;  %v1224_v20 = vpop.f32.mrb[24].mxu1 }
 0x370   :  { %v845_v21 = vpop.f32.mrb[25].mxu1  ;;  %v854_v23 = vadd.f32 %v1224_v20, %v988_v54 }
 0x371   :  { %v1225_v22 = vpop.f32.mrb[26].mxu1  ;;  %v846_v26 = vadd.f32 %v988_v54, %v845_v21 }
 0x372   :  { %v857_v24 = vadd.f32 %v1225_v22, %v988_v54  ;;  %v848_v25 = vpop.f32.mrb[27].mxu1 }
 0x373   :  { %v849_v27 = vadd.f32 %v988_v54, %v848_v25 }
 0x374   :  { %v1067_v28 = vpack.c.bf16 %v857_v24, %v854_v23 }
 0x375   :  { %v1062_v29 = vpack.c.bf16 %v849_v27, %v846_v26 }
 0x376   :  { %1075 = vst [vmem:[#allocation17 + $0x38] sm:$0xff] %v1067_v28  }
 0x377   :  { %1074 = vst [vmem:[#allocation17 + $0x30] sm:$0xff] %v1062_v29  }
 0x378   :  { %1499 = shalt.err (!%p1496_p6)
}
 0x379   :  { %s1500_s10 = scalar_lea.hbm %s1799_s9, 1024 }
 0x37a   :  { %p1501_p7 = scmp.ne.s32.totalorder %s1799_s9, %s1500_s10  ;;  %p1504_p8 = scmp.lt.u32.totalorder %s1500_s10, %s1799_s9 }
 0x37c   :  { %p1506_p9 = pnand %p1504_p8, %p1501_p7 }
 0x37e   :  { %1509 = shalt.err (!%p1506_p9)
}
 0x37f   :  { %951 = dma.vmem_to_hbm [thread:$0]  %s946_s24, 1024, %s1799_s9, [#allocation4], %s1528_s12, %s1528_s12, %s1529_s27  }
 0x380   :  { %1520 = dma.done.wait [#allocation4], 1024  }
 0x381   :  { %1521 = vsyncadd [#allocation4], 4294966272 }
 0x382   :  { %955 = vsyncpa [#allocation3], 1 }
 0x383   :  { %956 = vsyncpa [#allocation6], 1 }
 0x384   :  { %957 = vsyncpa [#allocation9], 1 }
 0x385   :  { %958 = vsyncpa [#allocation12], 1 }
 0x386   :  { %959 = vsyncpa [#allocation15], 1 }
 0x387   :  { %960 = vsyncpa [#allocation4], 1 }

</bundles_post_ra>
